<compile_context>
chip_gen: v6e
topology: v6e:2x2x1
jax: 0.10.0
libtpu: 0.0.40
codegen_flags: <defaults>
</compile_context>

<pallas_src>
import functools

import jax
import jax.numpy as jnp
from jax.experimental import pallas as pl
from jax.experimental.pallas import tpu as pltpu

LANE = 128
SUBLANE = 8
MAX_BATCH_TILE = 1024  # keeps the double-buffered f32 x block modest on every gen


def _round_up(n, m):
    return ((n + m - 1) // m) * m


def _leaky_relu(x, slope):
    return jnp.where(x > 0, x, slope * x)


# --------------------------------------------------------------------------
# Kernel
# --------------------------------------------------------------------------
def _encoder_kernel(x_ref, w1_ref, wh_ref, bh_ref, wout_ref, bout_ref, out_ref,
                    *, n_hidden, neg_slope):
    """x_ref: (tb, d_in_p) f32;  w1_ref: (d_in_p, d_hid_p) bf16;
    wh_ref: (d_hid_p, (n_hidden-1)*d_hid_p) bf16;  bh_ref: (n_hidden, d_hid_p) f32;
    wout_ref: (d_hid_p, d_head_p) bf16;  bout_ref: (1, d_head_p) f32;
    out_ref: (tb, d_head_p) f32."""
    d_hid_p = wh_ref.shape[0]

    # x arrives f32 straight from HBM; cast on the VPU (hidden under the DMA).
    h_mx = x_ref[...].astype(jnp.bfloat16)
    b_hid = bh_ref[...]  # (n_hidden, d_hid_p) f32, loaded once

    acc = jnp.dot(h_mx, w1_ref[...], preferred_element_type=jnp.float32)
    acc = acc + b_hid[0:1, :]
    h = _leaky_relu(acc, neg_slope)              # activations stay f32

    for l in range(1, n_hidden):                 # static unroll (3 or 4 layers)
        w = wh_ref[:, (l - 1) * d_hid_p:l * d_hid_p]   # static lane-aligned slice
        acc = jnp.dot(h.astype(jnp.bfloat16), w,
                      preferred_element_type=jnp.float32)
        acc = acc + b_hid[l:l + 1, :]
        h = _leaky_relu(acc, neg_slope)

    # Fused mean|log_var head -> one lane-dense output slab.
    out = jnp.dot(h.astype(jnp.bfloat16), wout_ref[...],
                  preferred_element_type=jnp.float32) + bout_ref[...]
    out_ref[...] = out.astype(out_ref.dtype)


# --------------------------------------------------------------------------
# One-time parameter packing (hoisted out of the per-call path)
# --------------------------------------------------------------------------
def prepare_params(params, *, img_size):
    """Pad to lane multiples, cast weights to bf16, fuse heads & stack biases.

    params: dict of (in, out)-layout f32 weights and (1, out) f32 biases.
    Returns (packed, meta).  Run once; reuse `packed` for every forward call.
    """
    use_fourth = img_size != 32
    hidden_names = ["1", "2", "3"] + (["4"] if use_fourth else [])
    n_hidden = len(hidden_names)

    d_in, d_hid = params["w1"].shape
    d_lat = params["wm"].shape[1]
    d_in_p = _round_up(d_in, LANE)
    d_hid_p = _round_up(d_hid, LANE)
    d_head = 2 * d_lat
    d_head_p = _round_up(d_head, LANE)

    def pad2(a, rows, cols, dtype):
        r, c = a.shape
        return jnp.pad(a, ((0, rows - r), (0, cols - c))).astype(dtype)

    # Zero padding is numerically exact: padded bias lanes are 0, LeakyReLU(0)=0.
    w1 = pad2(params["w1"], d_in_p, d_hid_p, jnp.bfloat16)

    # Remaining hidden weights fused into one (d_hid_p, (n_hidden-1)*d_hid_p) slab.
    w_hidden = jnp.concatenate(
        [pad2(params["w" + n], d_hid_p, d_hid_p, jnp.bfloat16)
         for n in hidden_names[1:]], axis=1)

    # All hidden biases stacked into a single (n_hidden, d_hid_p) f32 array.
    b_hidden = jnp.concatenate(
        [pad2(params["b" + n], 1, d_hid_p, jnp.float32) for n in hidden_names],
        axis=0)

    # Fused mean|log_var head: one matmul, one lane-dense output slab.
    w_head = pad2(jnp.concatenate([params["wm"], params["wv"]], axis=1),
                  d_hid_p, d_head_p, jnp.bfloat16)
    b_head = pad2(jnp.concatenate([params["bm"], params["bv"]], axis=1),
                  1, d_head_p, jnp.float32)

    packed = dict(w1=w1, w_hidden=w_hidden, b_hidden=b_hidden,
                  w_head=w_head, b_head=b_head)
    meta = dict(n_hidden=n_hidden, d_in=d_in, d_in_p=d_in_p, d_hid_p=d_hid_p,
                d_lat=d_lat, d_head=d_head, d_head_p=d_head_p)
    return packed, meta


# --------------------------------------------------------------------------
# Forward wrapper
# --------------------------------------------------------------------------
def encoder_forward(x, packed, meta, *, batch_tile=None, neg_slope=0.2):
    """x: (B, d_in) f32.  Returns (mean, log_var), each (B, d_latent) f32."""
    B, d_in = x.shape
    assert d_in == meta["d_in"], "input width does not match packed params"
    n_hidden = meta["n_hidden"]
    d_in_p, d_hid_p = meta["d_in_p"], meta["d_hid_p"]
    d_lat, d_head, d_head_p = meta["d_lat"], meta["d_head"], meta["d_head_p"]

    # ---- batch tile selection ---------------------------------------------
    if batch_tile is None:
        if B <= 32:
            tb = _round_up(B, SUBLANE)           # tiny batch: single tile
        else:
            # >=2 grid steps so both v7x TensorCores get work; multiple of 16
            # for bf16 (16,128) sublane packing; capped so the f32 x block
            # stays within every generation's VMEM budget.
            tb = min(_round_up(pl.cdiv(B, 2), 16), MAX_BATCH_TILE)
    else:
        tb = _round_up(batch_tile, SUBLANE)
    tb = max(tb, SUBLANE)
    B_p = _round_up(B, tb)
    grid = (B_p // tb,)

    # x stays f32 and is read directly by the kernel; pad only when needed
    # (for the test shapes d_in is already a multiple of 128 and B_p == B).
    if B_p != B or d_in_p != d_in:
        x_in = jnp.pad(x, ((0, B_p - B), (0, d_in_p - d_in)))
    else:
        x_in = x

    # ---- VMEM budget: double-buffered x/out blocks + resident weights ------
    x_block_bytes = tb * d_in_p * 4
    out_block_bytes = tb * d_head_p * 4
    w_bytes = ((packed["w1"].size + packed["w_hidden"].size
                + packed["w_head"].size) * 2
               + (packed["b_hidden"].size + packed["b_head"].size) * 4)
    interm_bytes = 6 * tb * max(d_hid_p, d_head_p) * 4   # h/acc/bf16 temporaries
    vmem_needed = 2 * (x_block_bytes + out_block_bytes) + 2 * w_bytes + interm_bytes
    vmem_limit = int(min(max(vmem_needed + (8 << 20), 16 << 20), 64 << 20))

    def const_spec(shape):
        return pl.BlockSpec(shape, lambda i: (0, 0))

    kernel = functools.partial(_encoder_kernel, n_hidden=n_hidden,
                               neg_slope=neg_slope)

    out = pl.pallas_call(
        kernel,
        out_shape=jax.ShapeDtypeStruct((B_p, d_head_p), jnp.float32),
        grid_spec=pltpu.PrefetchScalarGridSpec(
            num_scalar_prefetch=0,
            grid=grid,
            in_specs=[
                pl.BlockSpec((tb, d_in_p), lambda i: (i, 0)),   # x: batch-tiled
                const_spec(packed["w1"].shape),                 # weights: resident
                const_spec(packed["w_hidden"].shape),
                const_spec(packed["b_hidden"].shape),
                const_spec(packed["w_head"].shape),
                const_spec(packed["b_head"].shape),
            ],
            out_specs=pl.BlockSpec((tb, d_head_p), lambda i: (i, 0)),
        ),
        compiler_params=pltpu.CompilerParams(
            dimension_semantics=("parallel",),
            vmem_limit_bytes=vmem_limit,
        ),
    )(x_in, packed["w1"], packed["w_hidden"], packed["b_hidden"],
      packed["w_head"], packed["b_head"])

    # Lanes d_head..127 of the output slab are zero padding (accepted cost).
    mean = out[:B, :d_lat]
    log_var = out[:B, d_lat:d_head]
    return mean, log_var


# --------------------------------------------------------------------------
# Synthetic params + pure-JAX reference
# --------------------------------------------------------------------------
def init_params(key, d_in, d_hid, d_lat):
    """Deterministic synthetic parameters. Weights stored as (in, out), f32."""
    keys = jax.random.split(key, 12)

    def lin(kw, kb, fan_in, fan_out):
        bound = 1.0 / jnp.sqrt(fan_in)
        w = jax.random.uniform(kw, (fan_in, fan_out), jnp.float32, -bound, bound)
        b = jax.random.uniform(kb, (1, fan_out), jnp.float32, -bound, bound)
        return w, b

    w1, b1 = lin(keys[0], keys[1], d_in, d_hid)
    w2, b2 = lin(keys[2], keys[3], d_hid, d_hid)
    w3, b3 = lin(keys[4], keys[5], d_hid, d_hid)
    w4, b4 = lin(keys[6], keys[7], d_hid, d_hid)
    wm, bm = lin(keys[8], keys[9], d_hid, d_lat)
    wv, bv = lin(keys[10], keys[11], d_hid, d_lat)
    return dict(w1=w1, b1=b1, w2=w2, b2=b2, w3=w3, b3=b3, w4=w4, b4=b4,
                wm=wm, bm=bm, wv=wv, bv=bv)


def encoder_reference(x, params, *, img_size, neg_slope=0.2):
    """Pure-JAX f32 reference matching the PyTorch forward."""
    h = _leaky_relu(x @ params["w1"] + params["b1"], neg_slope)
    h = _leaky_relu(h @ params["w2"] + params["b2"], neg_slope)
    h = _leaky_relu(h @ params["w3"] + params["b3"], neg_slope)
    if img_size != 32:
        h = _leaky_relu(h @ params["w4"] + params["b4"], neg_slope)
    mean = h @ params["wm"] + params["bm"]
    log_var = h @ params["wv"] + params["bv"]
    return mean, log_var


if __name__ == "__main__":
    D_HID = 64
    D_LAT = 32
    BATCH = 8

    key = jax.random.PRNGKey(0)
    k_x, k_p = jax.random.split(key)

    ok = True
    for img_size in (16, 32):  # 16 -> 4 hidden layers, 32 -> 3 hidden layers
        d_in = img_size * img_size
        x = jax.random.normal(k_x, (BATCH, d_in), jnp.float32)
        params = init_params(k_p, d_in, D_HID, D_LAT)

        # One-time packing, outside the steady-state forward path.
        packed, meta = prepare_params(params, img_size=img_size)
        jax.block_until_ready(packed)

        mean, log_var = encoder_forward(x, packed, meta)
        jax.block_until_ready((mean, log_var))

        mean_ref, log_var_ref = encoder_reference(x, params, img_size=img_size)
        # bf16 matmul operands with f32 activations/accumulation vs f32 ref.
        ok &= bool(jnp.allclose(mean, mean_ref, atol=5e-2, rtol=5e-2))
        ok &= bool(jnp.allclose(log_var, log_var_ref, atol=5e-2, rtol=5e-2))

    assert ok
    print("KERNEL_OK")
</pallas_src>

<mosaic_0001>
module attributes {stable_mosaic.version = 11 : i64} {
  func.func @_encoder_kernel(%arg0: i32, %arg1: memref<8x256xf32, #tpu.memory_space<vmem>>, %arg2: memref<256x128xbf16, #tpu.memory_space<vmem>>, %arg3: memref<128x384xbf16, #tpu.memory_space<vmem>>, %arg4: memref<4x128xf32, #tpu.memory_space<vmem>>, %arg5: memref<128x128xbf16, #tpu.memory_space<vmem>>, %arg6: memref<1x128xf32, #tpu.memory_space<vmem>>, %arg7: memref<8x128xf32, #tpu.memory_space<vmem>>) attributes {dimension_semantics = [#tpu.dimension_semantics<parallel>], iteration_bounds = array<i64: 1>, scalar_prefetch = 0 : i64, scratch_operands = 0 : i64, tpu.core_type = #tpu.core_type<tc>, window_params = [{transform_indices = @transform_0, window_bounds = array<i64: 8, 256>}, {pipeline_mode = #tpu.pipeline_mode<synchronous>, transform_indices = @transform_1, window_bounds = array<i64: 256, 128>}, {pipeline_mode = #tpu.pipeline_mode<synchronous>, transform_indices = @transform_2, window_bounds = array<i64: 128, 384>}, {pipeline_mode = #tpu.pipeline_mode<synchronous>, transform_indices = @transform_3, window_bounds = array<i64: 4, 128>}, {pipeline_mode = #tpu.pipeline_mode<synchronous>, transform_indices = @transform_4, window_bounds = array<i64: 128, 128>}, {pipeline_mode = #tpu.pipeline_mode<synchronous>, transform_indices = @transform_5, window_bounds = array<i64: 1, 128>}, {transform_indices = @transform_6, window_bounds = array<i64: 8, 128>}]} {
    %c0 = arith.constant 0 : index
    %c0_0 = arith.constant 0 : index
    %0 = vector.load %arg1[%c0, %c0_0] : memref<8x256xf32, #tpu.memory_space<vmem>>, vector<8x256xf32>
    %1 = arith.truncf %0 : vector<8x256xf32> to vector<8x256xbf16>
    %c0_1 = arith.constant 0 : index
    %c0_2 = arith.constant 0 : index
    %2 = vector.load %arg4[%c0_1, %c0_2] : memref<4x128xf32, #tpu.memory_space<vmem>>, vector<4x128xf32>
    %c0_3 = arith.constant 0 : index
    %c0_4 = arith.constant 0 : index
    %3 = vector.load %arg2[%c0_3, %c0_4] : memref<256x128xbf16, #tpu.memory_space<vmem>>, vector<256x128xbf16>
    %cst = arith.constant dense<0.000000e+00> : vector<8x128xf32>
    %4 = tpu.matmul %1, %3, %cst {dimension_numbers = #tpu.dot_dimension_numbers<[1], [0], [0], [1], [0, 0, 1, 1], [], []>} : vector<8x256xbf16>, vector<256x128xbf16>, vector<8x128xf32> -> vector<8x128xf32>
    %5 = vector.extract_strided_slice %2 {offsets = [0, 0], sizes = [1, 128], strides = [1, 1]} : vector<4x128xf32> to vector<1x128xf32>
    %6 = vector.broadcast %5 : vector<1x128xf32> to vector<8x128xf32>
    %7 = arith.addf %4, %6 : vector<8x128xf32>
    %cst_5 = arith.constant 0.000000e+00 : f32
    %8 = vector.broadcast %cst_5 : f32 to vector<8x128xf32>
    %9 = arith.cmpf ogt, %7, %8 : vector<8x128xf32>
    %cst_6 = arith.constant 2.000000e-01 : f32
    %10 = vector.broadcast %cst_6 : f32 to vector<8x128xf32>
    %11 = arith.mulf %10, %7 : vector<8x128xf32>
    %12 = arith.select %9, %7, %11 : vector<8x128xi1>, vector<8x128xf32>
    %c0_7 = arith.constant 0 : index
    %c0_8 = arith.constant 0 : index
    %13 = vector.load %arg3[%c0_7, %c0_8] : memref<128x384xbf16, #tpu.memory_space<vmem>>, vector<128x128xbf16>
    %14 = arith.truncf %12 : vector<8x128xf32> to vector<8x128xbf16>
    %cst_9 = arith.constant dense<0.000000e+00> : vector<8x128xf32>
    %15 = tpu.matmul %14, %13, %cst_9 {dimension_numbers = #tpu.dot_dimension_numbers<[1], [0], [0], [1], [0, 0, 1, 1], [], []>} : vector<8x128xbf16>, vector<128x128xbf16>, vector<8x128xf32> -> vector<8x128xf32>
    %16 = vector.extract_strided_slice %2 {offsets = [1, 0], sizes = [1, 128], strides = [1, 1]} : vector<4x128xf32> to vector<1x128xf32>
    %17 = vector.broadcast %16 : vector<1x128xf32> to vector<8x128xf32>
    %18 = arith.addf %15, %17 : vector<8x128xf32>
    %cst_10 = arith.constant 0.000000e+00 : f32
    %19 = vector.broadcast %cst_10 : f32 to vector<8x128xf32>
    %20 = arith.cmpf ogt, %18, %19 : vector<8x128xf32>
    %cst_11 = arith.constant 2.000000e-01 : f32
    %21 = vector.broadcast %cst_11 : f32 to vector<8x128xf32>
    %22 = arith.mulf %21, %18 : vector<8x128xf32>
    %23 = arith.select %20, %18, %22 : vector<8x128xi1>, vector<8x128xf32>
    %c0_12 = arith.constant 0 : index
    %c128 = arith.constant 128 : index
    %24 = vector.load %arg3[%c0_12, %c128] : memref<128x384xbf16, #tpu.memory_space<vmem>>, vector<128x128xbf16>
    %25 = arith.truncf %23 : vector<8x128xf32> to vector<8x128xbf16>
    %cst_13 = arith.constant dense<0.000000e+00> : vector<8x128xf32>
    %26 = tpu.matmul %25, %24, %cst_13 {dimension_numbers = #tpu.dot_dimension_numbers<[1], [0], [0], [1], [0, 0, 1, 1], [], []>} : vector<8x128xbf16>, vector<128x128xbf16>, vector<8x128xf32> -> vector<8x128xf32>
    %27 = vector.extract_strided_slice %2 {offsets = [2, 0], sizes = [1, 128], strides = [1, 1]} : vector<4x128xf32> to vector<1x128xf32>
    %28 = vector.broadcast %27 : vector<1x128xf32> to vector<8x128xf32>
    %29 = arith.addf %26, %28 : vector<8x128xf32>
    %cst_14 = arith.constant 0.000000e+00 : f32
    %30 = vector.broadcast %cst_14 : f32 to vector<8x128xf32>
    %31 = arith.cmpf ogt, %29, %30 : vector<8x128xf32>
    %cst_15 = arith.constant 2.000000e-01 : f32
    %32 = vector.broadcast %cst_15 : f32 to vector<8x128xf32>
    %33 = arith.mulf %32, %29 : vector<8x128xf32>
    %34 = arith.select %31, %29, %33 : vector<8x128xi1>, vector<8x128xf32>
    %c0_16 = arith.constant 0 : index
    %c256 = arith.constant 256 : index
    %35 = vector.load %arg3[%c0_16, %c256] : memref<128x384xbf16, #tpu.memory_space<vmem>>, vector<128x128xbf16>
    %36 = arith.truncf %34 : vector<8x128xf32> to vector<8x128xbf16>
    %cst_17 = arith.constant dense<0.000000e+00> : vector<8x128xf32>
    %37 = tpu.matmul %36, %35, %cst_17 {dimension_numbers = #tpu.dot_dimension_numbers<[1], [0], [0], [1], [0, 0, 1, 1], [], []>} : vector<8x128xbf16>, vector<128x128xbf16>, vector<8x128xf32> -> vector<8x128xf32>
    %38 = vector.extract_strided_slice %2 {offsets = [3, 0], sizes = [1, 128], strides = [1, 1]} : vector<4x128xf32> to vector<1x128xf32>
    %39 = vector.broadcast %38 : vector<1x128xf32> to vector<8x128xf32>
    %40 = arith.addf %37, %39 : vector<8x128xf32>
    %cst_18 = arith.constant 0.000000e+00 : f32
    %41 = vector.broadcast %cst_18 : f32 to vector<8x128xf32>
    %42 = arith.cmpf ogt, %40, %41 : vector<8x128xf32>
    %cst_19 = arith.constant 2.000000e-01 : f32
    %43 = vector.broadcast %cst_19 : f32 to vector<8x128xf32>
    %44 = arith.mulf %43, %40 : vector<8x128xf32>
    %45 = arith.select %42, %40, %44 : vector<8x128xi1>, vector<8x128xf32>
    %46 = arith.truncf %45 : vector<8x128xf32> to vector<8x128xbf16>
    %c0_20 = arith.constant 0 : index
    %c0_21 = arith.constant 0 : index
    %47 = vector.load %arg5[%c0_20, %c0_21] : memref<128x128xbf16, #tpu.memory_space<vmem>>, vector<128x128xbf16>
    %cst_22 = arith.constant dense<0.000000e+00> : vector<8x128xf32>
    %48 = tpu.matmul %46, %47, %cst_22 {dimension_numbers = #tpu.dot_dimension_numbers<[1], [0], [0], [1], [0, 0, 1, 1], [], []>} : vector<8x128xbf16>, vector<128x128xbf16>, vector<8x128xf32> -> vector<8x128xf32>
    %c0_23 = arith.constant 0 : index
    %c0_24 = arith.constant 0 : index
    %49 = vector.load %arg6[%c0_23, %c0_24] : memref<1x128xf32, #tpu.memory_space<vmem>>, vector<1x128xf32>
    %50 = vector.broadcast %49 : vector<1x128xf32> to vector<8x128xf32>
    %51 = arith.addf %48, %50 : vector<8x128xf32>
    %c0_25 = arith.constant 0 : index
    %c0_26 = arith.constant 0 : index
    %52 = vector.load %arg7[%c0_25, %c0_26] : memref<8x128xf32, #tpu.memory_space<vmem>>, vector<8x128xf32>
    tpu.vector_store %arg7[%c0_25, %c0_26], %51 {strides = array<i32>} : memref<8x128xf32, #tpu.memory_space<vmem>>, vector<8x128xf32>,
    return
  }
  func.func @transform_0(%arg0: i32) -> (i32, i32) {
    %c0_i32 = arith.constant 0 : i32
    %c0_i32_0 = arith.constant 0 : i32
    return %arg0, %c0_i32 : i32, i32
  }
  func.func @transform_1(%arg0: i32) -> (i32, i32) {
    %c0_i32 = arith.constant 0 : i32
    %c0_i32_0 = arith.constant 0 : i32
    %c0_i32_1 = arith.constant 0 : i32
    return %c0_i32, %c0_i32_0 : i32, i32
  }
  func.func @transform_2(%arg0: i32) -> (i32, i32) {
    %c0_i32 = arith.constant 0 : i32
    %c0_i32_0 = arith.constant 0 : i32
    %c0_i32_1 = arith.constant 0 : i32
    return %c0_i32, %c0_i32_0 : i32, i32
  }
  func.func @transform_3(%arg0: i32) -> (i32, i32) {
    %c0_i32 = arith.constant 0 : i32
    %c0_i32_0 = arith.constant 0 : i32
    %c0_i32_1 = arith.constant 0 : i32
    return %c0_i32, %c0_i32_0 : i32, i32
  }
  func.func @transform_4(%arg0: i32) -> (i32, i32) {
    %c0_i32 = arith.constant 0 : i32
    %c0_i32_0 = arith.constant 0 : i32
    %c0_i32_1 = arith.constant 0 : i32
    return %c0_i32, %c0_i32_0 : i32, i32
  }
  func.func @transform_5(%arg0: i32) -> (i32, i32) {
    %c0_i32 = arith.constant 0 : i32
    %c0_i32_0 = arith.constant 0 : i32
    %c0_i32_1 = arith.constant 0 : i32
    return %c0_i32, %c0_i32_0 : i32, i32
  }
  func.func @transform_6(%arg0: i32) -> (i32, i32) {
    %c0_i32 = arith.constant 0 : i32
    %c0_i32_0 = arith.constant 0 : i32
    return %arg0, %c0_i32 : i32, i32
  }
}

</mosaic_0001>

<bundles_post_ra>
// kernel: tpu_custom_call.1
= control target key start
LH: loop header
LB: loop body
LE: loop exit
PB: predicated region body
PF: predicated region fallthrough
CT: control target
= control target key end

     0   :  { %11 = vsyncpa [#allocation3], 0  ;;  %s1203_s0 = inlined_call_operand.hbm [shape: f32[8,256], index: 0, kind: input, shape index: {}]   ;;  %s1204_s1 = inlined_call_operand.hbm [shape: bf16[256,128], index: 1, kind: input, shape index: {}]   ;;  %s1205_s2 = inlined_call_operand.hbm [shape: bf16[128,384], index: 2, kind: input, shape index: {}]   ;;  %s1206_s3 = inlined_call_operand.vmem [shape: f32[4,128], index: 3, kind: input, shape index: {}]   ;;  %s1207_s4 = inlined_call_operand.hbm [shape: bf16[128,128], index: 4, kind: input, shape index: {}]   ;;  %s1208_s5 = inlined_call_operand.vmem [shape: f32[1,128], index: 5, kind: input, shape index: {}]   ;;  %s1209_s6 = inlined_call_operand.hbm [shape: f32[8,128], index: 6, kind: output, shape index: {}]  }
   0x1   :  { %12 = vsyncpa [#allocation6], 0 }
   0x2   :  { %13 = vsyncpa [#allocation9], 0 }
   0x3   :  { %14 = vsyncpa [#allocation4], 0  ;;  %s1078_s21 = smov [#allocation5]  }
   0x4   :  { %s30_s22 = sshll.u32 %s1078_s21, 4  ;;  %s31_s22 = int_to_ptr.vmem [resolvable:$true] %s30_s22 }
   0x5   :  { %s978_s23 = scalar_lea.vmem %s31_s22, 2048  ;;  %p983_p1 = scmp.lt.s32.totalorder %s31_s22, %s31_s22 }
   0x6   :  { %p979_p0 = scmp.ne.s32.totalorder %s31_s22, %s978_s23  ;;  %p984_p2 = scmp.lt.s32.totalorder %s978_s23, %s978_s23 }
   0x8   :  { %p985_p3 = por %p984_p2, %p983_p1 }
   0xa   :  { %p986_p4 = pnand %p985_p3, %p979_p0 }
   0xc   :  { %989 = shalt.err (!%p986_p4)
}
   0xd   :  { %s1079_s24 = smov 64   ;;  %s1080_s25 = smov 4  }
   0xe   :  { %36 = dma.hbm_to_vmem [thread:$0]  %s1204_s1, 2048, %s31_s22, [#allocation6], %s1079_s24, %s1079_s24, %s1080_s25  }
   0xf   :  { %s1081_s28 = smov [#allocation2]   ;;  %s1082_s30 = smov [#allocation7]  }
  0x10   :  { %s21_s29 = sshll.u32 %s1081_s28, 4  ;;  %s42_s7 = sshll.u32 %s1082_s30, 4  ;;  %s22_s29 = int_to_ptr.vmem [resolvable:$true] %s21_s29  ;;  %s43_s7 = int_to_ptr.vmem [resolvable:$true] %s42_s7 }
  0x11   :  { %s998_s8 = scalar_lea.vmem %s22_s29, 256  ;;  %p1003_p6 = scmp.lt.s32.totalorder %s22_s29, %s22_s29 }
  0x12   :  { %p999_p5 = scmp.ne.s32.totalorder %s22_s29, %s998_s8  ;;  %p1004_p7 = scmp.lt.s32.totalorder %s998_s8, %s998_s8 }
  0x14   :  { %p1005_p8 = por %p1004_p7, %p1003_p6 }
  0x16   :  { %p1006_p9 = pnand %p1005_p8, %p999_p5 }
  0x18   :  { %1009 = shalt.err (!%p1006_p9)
}
  0x19   :  { %24 = dma.hbm_to_vmem [thread:$0]  %s1203_s0, 256, %s22_s29, [#allocation3]  }
  0x1a   :  { %s1018_s11 = scalar_lea.vmem %s43_s7, 3072  ;;  %p1023_p11 = scmp.lt.s32.totalorder %s43_s7, %s43_s7 }
  0x1b   :  { %p1019_p10 = scmp.ne.s32.totalorder %s43_s7, %s1018_s11  ;;  %p1024_p12 = scmp.lt.s32.totalorder %s1018_s11, %s1018_s11 }
  0x1d   :  { %p1025_p13 = por %p1024_p12, %p1023_p11 }
  0x1f   :  { %p1026_p0 = pnand %p1025_p13, %p1019_p10 }
  0x21   :  { %1029 = shalt.err (!%p1026_p0)
}
  0x22   :  { %s1083_s1 = smov 192   ;;  %s1084_s12 = smov 12  }
  0x23   :  { %48 = dma.hbm_to_vmem [thread:$0]  %s1205_s2, 3072, %s43_s7, [#allocation6], %s1083_s1, %s1083_s1, %s1084_s12  }
  0x24   :  { %s1085_s15 = smov [#allocation8]  }
  0x25   :  { %s56_s16 = sshll.u32 %s1085_s15, 4  ;;  %s57_s16 = int_to_ptr.vmem [resolvable:$true] %s56_s16 }
  0x26   :  { %s1038_s17 = scalar_lea.vmem %s57_s16, 1024  ;;  %p1043_p2 = scmp.lt.s32.totalorder %s57_s16, %s57_s16 }
  0x27   :  { %p1039_p1 = scmp.ne.s32.totalorder %s57_s16, %s1038_s17  ;;  %p1044_p3 = scmp.lt.s32.totalorder %s1038_s17, %s1038_s17 }
  0x29   :  { %p1045_p4 = por %p1044_p3, %p1043_p2 }
  0x2b   :  { %p1046_p5 = pnand %p1045_p4, %p1039_p1 }
  0x2d   :  { %1049 = shalt.err (!%p1046_p5)
}
  0x2e   :  { %62 = dma.hbm_to_vmem [thread:$0]  %s1207_s4, 1024, %s57_s16, [#allocation9], %s1079_s24, %s1079_s24, %s1080_s25  }
  0x2f   :  { %1070 = dma.done.wait [#allocation3], 256  }
  0x30   :  { %1071 = vsyncadd [#allocation3], 4294967040 }
  0x31   :  { %1072 = dma.done.wait [#allocation6], 5120  }
  0x32   :  { %1073 = vsyncadd [#allocation6], 4294962176 }
  0x33   :  { %1074 = dma.done.wait [#allocation9], 1024  }
  0x34   :  { %1075 = vsyncadd [#allocation9], 4294966272  ;;  %v1086_v0 = vmov 0.0   ;;  %v922_v1 = vld [vmem:[#allocation5 + $0x78] sm:$0xff]   ;;  %v924_v3 = vld [vmem:[#allocation5 + $0x70] sm:$0xff]   ;;  %vm1087_vm0 = vmmov 0   ;;  %v115_v35 = vlaneseq }
  0x35   :  { %831 = vmatprep.subr.bf16.mxu1 %v1086_v0  ;;  %v923_v2 = vld [vmem:[#allocation5 + $0x38] sm:$0xff]   ;;  %773 = vmatprep.subr.bf16.mxu0 %v922_v1  ;;  %v925_v4 = vld [vmem:[#allocation5 + $0x30] sm:$0xff]   ;;  %v926_v5 = vld [vmem:[#allocation5 + $0x68] sm:$0xff]   ;;  %s1088_s20 = smov [#allocation10]  }
  0x36   :  { %774 = vmatpush3.bf16.msra.mxu0 %v923_v2  ;;  %v927_v6 = vld [vmem:[#allocation5 + $0x28] sm:$0xff]   ;;  %v928_v7 = vld [vmem:[#allocation5 + $0x60] sm:$0xff]   ;;  %v930_v9 = vld [vmem:[#allocation5 + $0x58] sm:$0xff]   ;;  %847 = vmatprep.mubr.msk.bf16.mxu1 %vm1087_vm0, %v1086_v0  ;;  %v1162_v36 = vshrl.u32 %v115_v35, 7  ;;  %s713_s21 = sshll.u32 %s1088_s20, 4  ;;  %s714_s21 = int_to_ptr.vmem [resolvable:$true] %s713_s21 }
  0x37   :  { %775 = vmatprep.subr.bf16.mxu0 %v924_v3  ;;  %v929_v8 = vld [vmem:[#allocation5 + $0x20] sm:$0xff]   ;;  %v931_v10 = vld [vmem:[#allocation5 + $0x18] sm:$0xff]   ;;  %v932_v11 = vld [vmem:[#allocation5 + $0x50] sm:$0xff]   ;;  %s1050_s22 = scalar_lea.vmem %s714_s21, 128  ;;  %p1055_p7 = scmp.lt.s32.totalorder %s714_s21, %s714_s21 }
  0x38   :  { %v79_v12 = vld [vmem:[#allocation2 + $0x8] sm:$0xff]  ;;  %v938_v14 = vld [vmem:[#allocation7 + $0xa8] ss:$12 sps:$4 sm:$0xff]   ;;  %v936_v19 = vld [vmem:[#allocation5 + $0x40] sm:$0xff]   ;;  %v117_v37 = vsub.s32 0, %v1162_v36  ;;  %v277_v57 = vsub.s32 1, %v1162_v36  ;;  %p1051_p6 = scmp.ne.s32.totalorder %s714_s21, %s1050_s22  ;;  %p1056_p8 = scmp.lt.s32.totalorder %s1050_s22, %s1050_s22 }
  0x39   :  { %v81_v13 = vpack.c.bf16 %v79_v12, %v79_v12  ;;  %v933_v15 = vld [vmem:[#allocation5 + $0x10] sm:$0xff]   ;;  %v934_v16 = vld [vmem:[#allocation5 + $0x48] sm:$0xff]   ;;  %832 = vmatpush3.bf16.msra.mxu1 %v938_v14  ;;  %v940_v20 = vld [vmem:[#allocation7 + $0x78] ss:$12 sps:$4 sm:$0xff]   ;;  %v389_v12 = vsub.s32 2, %v1162_v36 }
  0x3a   :  { %776 = vmatpush3.bf16.msra.mxu0 %v925_v4  ;;  %v939_v17 = vld [vmem:[#allocation7 + $0x90] ss:$12 sps:$4 sm:$0xff]   ;;  %v935_v18 = vld [vmem:[#allocation5 + $0x8] sm:$0xff]   ;;  %833 = vmatprep.subr.bf16.mxu1 %v1086_v0  ;;  %v937_v21 = vld [vmem:[#allocation5] sm:$0xff]   ;;  %p1057_p9 = por %p1056_p8, %p1055_p7 }
  0x3b   :  { %777 = vmatprep.subr.bf16.mxu0 %v926_v5  ;;  %247 = vmatprep.mubr.bf16.mxu0 %v81_v13  ;;  %v78_v22 = vld [vmem:[#allocation2] sm:$0xff]  ;;  %v941_v23 = vld [vmem:[#allocation7 + $0x60] ss:$12 sps:$4 sm:$0xff]   ;;  %v944_v27 = vld [vmem:[#allocation7 + $0x18] ss:$12 sps:$4 sm:$0xff]  }
  0x3c   :  { %v80_v24 = vpack.c.bf16 %v78_v22, %v78_v22  ;;  %v942_v25 = vld [vmem:[#allocation7 + $0x48] ss:$12 sps:$4 sm:$0xff]   ;;  %v943_v26 = vld [vmem:[#allocation7 + $0x30] ss:$12 sps:$4 sm:$0xff]   ;;  %v945_v28 = vld [vmem:[#allocation7] ss:$12 sps:$4 sm:$0xff]   ;;  %p1058_p10 = pnand %p1057_p9, %p1051_p6 }
  0x3d   :  { %834 = vmatpush3.bf16.msra.mxu1 %v939_v17  ;;  %v946_v29 = vld [vmem:[#allocation7 + $0xac] ss:$12 sps:$4 sm:$0xff]   ;;  %v947_v30 = vld [vmem:[#allocation7 + $0x94] ss:$12 sps:$4 sm:$0xff]   ;;  %v948_v31 = vld [vmem:[#allocation7 + $0x7c] ss:$12 sps:$4 sm:$0xff]  }
  0x3e   :  { %778 = vmatpush3.bf16.msra.mxu0 %v927_v6  ;;  %835 = vmatprep.subr.bf16.mxu1 %v1086_v0  ;;  %v949_v32 = vld [vmem:[#allocation7 + $0x64] ss:$12 sps:$4 sm:$0xff]   ;;  %v950_v33 = vld [vmem:[#allocation7 + $0x4c] ss:$12 sps:$4 sm:$0xff]   ;;  %v951_v34 = vld [vmem:[#allocation7 + $0x34] ss:$12 sps:$4 sm:$0xff]  }
  0x3f   :  { %779 = vmatprep.subr.bf16.mxu0 %v928_v7  ;;  %v1168_v38 = vld [vmem:[%s1206_s3] sm:$0xf]  ;;  %v952_v49 = vld [vmem:[#allocation7 + $0x1c] ss:$12 sps:$4 sm:$0xff]   ;;  %v955_v52 = vld [vmem:[#allocation7 + $0x98] ss:$12 sps:$4 sm:$0xff]  }
  0x40   :  { %v118_v40 = vrot.slane %v1168_v38, %v117_v37  ;;  %v953_v50 = vld [vmem:[#allocation7 + $0x4] ss:$12 sps:$4 sm:$0xff]   ;;  %v956_v53 = vld [vmem:[#allocation7 + $0x80] ss:$12 sps:$4 sm:$0xff]   ;;  %v957_v54 = vld [vmem:[#allocation7 + $0x68] ss:$12 sps:$4 sm:$0xff]   ;;  %v278_v58 = vrot.slane %v1168_v38, %v277_v57  ;;  %v390_v13 = vrot.slane %v1168_v38, %v389_v12 }
  0x41   :  { %836 = vmatpush3.bf16.msra.mxu1 %v940_v20  ;;  %v954_v51 = vld [vmem:[#allocation7 + $0xb0] ss:$12 sps:$4 sm:$0xff]   ;;  %v959_v56 = vld [vmem:[#allocation7 + $0x38] ss:$12 sps:$4 sm:$0xff]   ;;  %v960_v4 = vld [vmem:[#allocation7 + $0x20] ss:$12 sps:$4 sm:$0xff]  }
  0x42   :  { %780 = vmatpush3.bf16.msra.mxu0 %v929_v8  ;;  %837 = vmatprep.subr.bf16.mxu1 %v1086_v0  ;;  %v958_v55 = vld [vmem:[#allocation7 + $0x50] ss:$12 sps:$4 sm:$0xff]   ;;  %v961_v5 = vld [vmem:[#allocation7 + $0x8] ss:$12 sps:$4 sm:$0xff]  }
  0x43   :  { %781 = vmatprep.subr.bf16.mxu0 %v930_v9  ;;  %v962_v6 = vld [vmem:[#allocation8 + $0x38] sm:$0xff]   ;;  %v963_v7 = vld [vmem:[#allocation8 + $0x30] sm:$0xff]   ;;  %v964_v8 = vld [vmem:[#allocation8 + $0x28] sm:$0xff]  }
  0x44   :  { %v965_v9 = vld [vmem:[#allocation8 + $0x20] sm:$0xff]   ;;  %v968_v22 = vld [vmem:[#allocation8 + $0x8] sm:$0xff]  }
  0x45   :  { %838 = vmatpush3.bf16.msra.mxu1 %v941_v23  ;;  %v969_v23 = vld [vmem:[#allocation8] sm:$0xff]  }
  0x46   :  { %782 = vmatpush3.bf16.msra.mxu0 %v931_v10  ;;  %839 = vmatprep.subr.bf16.mxu1 %v1086_v0  ;;  %v966_v10 = vld [vmem:[#allocation8 + $0x18] sm:$0xff]  }
  0x47   :  { %783 = vmatprep.subr.bf16.mxu0 %v932_v11  ;;  %v967_v11 = vld [vmem:[#allocation8 + $0x10] sm:$0xff]  }
  0x49   :  { %840 = vmatpush3.bf16.msra.mxu1 %v942_v25 }
  0x4a   :  { %784 = vmatpush3.bf16.msra.mxu0 %v933_v15  ;;  %841 = vmatprep.subr.bf16.mxu1 %v1086_v0 }
  0x4b   :  { %785 = vmatprep.subr.bf16.mxu0 %v934_v16 }
  0x4d   :  { %842 = vmatpush3.bf16.msra.mxu1 %v943_v26 }
  0x4e   :  { %786 = vmatpush3.bf16.msra.mxu0 %v935_v18  ;;  %843 = vmatprep.subr.bf16.mxu1 %v1086_v0 }
  0x4f   :  { %787 = vmatprep.subr.bf16.mxu0 %v936_v19 }
  0x51   :  { %844 = vmatpush3.bf16.msra.mxu1 %v944_v27 }
  0x52   :  { %788 = vmatpush3.bf16.msra.mxu0 %v937_v21  ;;  %845 = vmatprep.subr.bf16.mxu1 %v1086_v0 }
  0x53   :  { %851 = vmatprep.subr.bf16.mxu0 %v1086_v0 }
  0x55   :  { %248 = vmatmul.mubr.bf16.vlgmr.msra.gmra.mxu0 %v80_v24  ;;  %846 = vmatpush3.bf16.msra.mxu1 %v945_v28  ;;  %v501_v24 = vsub.s32 3, %v1162_v36 }
  0x56   :  { %867 = vmatprep.mubr.msk.bf16.mxu0 %vm1087_vm0, %v1086_v0  ;;  %871 = vmatprep.subr.bf16.mxu1 %v1086_v0 }
  0x57   :  { %852 = vmatpush3.bf16.msra.mxu0 %v946_v29  ;;  %v502_v25 = vrot.slane %v1168_v38, %v501_v24 }
  0x58   :  { %853 = vmatprep.subr.bf16.mxu0 %v1086_v0 }
  0x5b   :  { %854 = vmatpush3.bf16.msra.mxu0 %v947_v30 }
  0x5c   :  { %855 = vmatprep.subr.bf16.mxu0 %v1086_v0 }
  0x5f   :  { %856 = vmatpush3.bf16.msra.mxu0 %v948_v31 }
  0x60   :  { %857 = vmatprep.subr.bf16.mxu0 %v1086_v0 }
  0x63   :  { %858 = vmatpush3.bf16.msra.mxu0 %v949_v32 }
  0x64   :  { %859 = vmatprep.subr.bf16.mxu0 %v1086_v0 }
  0x67   :  { %860 = vmatpush3.bf16.msra.mxu0 %v950_v33 }
  0x68   :  { %861 = vmatprep.subr.bf16.mxu0 %v1086_v0 }
  0x6b   :  { %862 = vmatpush3.bf16.msra.mxu0 %v951_v34 }
  0x6c   :  { %863 = vmatprep.subr.bf16.mxu0 %v1086_v0 }
  0x6f   :  { %864 = vmatpush3.bf16.msra.mxu0 %v952_v49 }
  0x70   :  { %865 = vmatprep.subr.bf16.mxu0 %v1086_v0 }
  0x73   :  { %866 = vmatpush3.bf16.msra.mxu0 %v953_v50 }
  0x74   :  { %891 = vmatprep.subr.bf16.mxu0 %v1086_v0 }
 0x115   :  { %v789_v39 = vpop.f32.mrf.mxu0 }
 0x117   :  { %v790_v41 = vpop.f32.mrf.mxu0 }
 0x118   :  { %v791_v42 = vadd.f32 %v790_v41, %v789_v39 }
 0x119   :  { %v792_v43 = vpop.f32.mrf.mxu0 }
 0x11a   :  { %v250_v44 = vadd.f32 %v791_v42, %v118_v40 }
 0x11b   :  { %v793_v45 = vpop.f32.mrf.mxu0 }
 0x11c   :  { %v256_v46 = vmul.f32 0.2, %v250_v44  ;;  %vm255_vm1 = vcmp.gt.f32.partialorder %v250_v44, 0.0 }
 0x11e   :  { %v257_v47 = vsel %vm255_vm1, %v250_v44, %v256_v46 }
 0x11f   :  { %v274_v48 = vpack.c.bf16 %v257_v47, %v257_v47 }
 0x121   :  { %848 = vmatmul.mubr.bf16.vlgmr.msra.gmra.mxu1 %v274_v48 }
 0x122   :  { %887 = vmatprep.mubr.msk.bf16.mxu1 %vm1087_vm0, %v1086_v0  ;;  %872 = vmatpush3.bf16.msra.mxu1 %v954_v51 }
 0x123   :  { %873 = vmatprep.subr.bf16.mxu1 %v1086_v0 }
 0x126   :  { %874 = vmatpush3.bf16.msra.mxu1 %v955_v52 }
 0x127   :  { %875 = vmatprep.subr.bf16.mxu1 %v1086_v0 }
 0x12a   :  { %876 = vmatpush3.bf16.msra.mxu1 %v956_v53 }
 0x12b   :  { %877 = vmatprep.subr.bf16.mxu1 %v1086_v0 }
 0x12e   :  { %878 = vmatpush3.bf16.msra.mxu1 %v957_v54 }
 0x12f   :  { %879 = vmatprep.subr.bf16.mxu1 %v1086_v0 }
 0x132   :  { %880 = vmatpush3.bf16.msra.mxu1 %v958_v55 }
 0x133   :  { %881 = vmatprep.subr.bf16.mxu1 %v1086_v0 }
 0x136   :  { %882 = vmatpush3.bf16.msra.mxu1 %v959_v56 }
 0x137   :  { %883 = vmatprep.subr.bf16.mxu1 %v1086_v0 }
 0x13a   :  { %884 = vmatpush3.bf16.msra.mxu1 %v960_v4 }
 0x13b   :  { %885 = vmatprep.subr.bf16.mxu1 %v1086_v0 }
 0x13e   :  { %886 = vmatpush3.bf16.msra.mxu1 %v961_v5 }
 0x1e1   :  { %v361_v59 = vpop.f32.mrf.mxu1 }
 0x1e2   :  { %v362_v60 = vadd.f32 %v361_v59, %v278_v58 }
 0x1e3   :  { %v849_v61 = vpop.f32.mrf.mxu1 }
 0x1e4   :  { %vm367_vm2 = vcmp.gt.f32.partialorder %v362_v60, 0.0  ;;  %v368_v62 = vmul.f32 0.2, %v362_v60 }
 0x1e5   :  { %v364_v63 = vpop.f32.mrf.mxu1 }
 0x1e6   :  { %v369_v1 = vsel %vm367_vm2, %v362_v60, %v368_v62 }
 0x1e7   :  { %v386_v2 = vpack.c.bf16 %v369_v1, %v369_v1  ;;  %v850_v3 = vpop.f32.mrf.mxu1 }
 0x1e9   :  { %868 = vmatmul.mubr.bf16.vlgmr.msra.gmra.mxu0 %v386_v2 }
 0x1ea   :  { %907 = vmatprep.mubr.msk.bf16.mxu0 %vm1087_vm0, %v1086_v0  ;;  %892 = vmatpush3.bf16.msra.mxu0 %v962_v6 }
 0x1eb   :  { %893 = vmatprep.subr.bf16.mxu0 %v1086_v0 }
 0x1ee   :  { %894 = vmatpush3.bf16.msra.mxu0 %v963_v7 }
 0x1ef   :  { %895 = vmatprep.subr.bf16.mxu0 %v1086_v0 }
 0x1f2   :  { %896 = vmatpush3.bf16.msra.mxu0 %v964_v8 }
 0x1f3   :  { %897 = vmatprep.subr.bf16.mxu0 %v1086_v0 }
 0x1f6   :  { %898 = vmatpush3.bf16.msra.mxu0 %v965_v9 }
 0x1f7   :  { %899 = vmatprep.subr.bf16.mxu0 %v1086_v0 }
 0x1fa   :  { %900 = vmatpush3.bf16.msra.mxu0 %v966_v10 }
 0x1fb   :  { %901 = vmatprep.subr.bf16.mxu0 %v1086_v0 }
 0x1fe   :  { %902 = vmatpush3.bf16.msra.mxu0 %v967_v11 }
 0x1ff   :  { %903 = vmatprep.subr.bf16.mxu0 %v1086_v0 }
 0x202   :  { %904 = vmatpush3.bf16.msra.mxu0 %v968_v22 }
 0x203   :  { %905 = vmatprep.subr.bf16.mxu0 %v1086_v0  ;;  %v764_v0 = vld [vmem:[%s1208_s5] ss:$0 sm:$0xff] }
 0x206   :  { %906 = vmatpush3.bf16.msra.mxu0 %v969_v23 }
 0x2a9   :  { %v473_v14 = vpop.f32.mrf.mxu0 }
 0x2aa   :  { %v474_v15 = vadd.f32 %v473_v14, %v390_v13 }
 0x2ab   :  { %v869_v16 = vpop.f32.mrf.mxu0 }
 0x2ac   :  { %vm479_vm3 = vcmp.gt.f32.partialorder %v474_v15, 0.0  ;;  %v480_v17 = vmul.f32 0.2, %v474_v15 }
 0x2ad   :  { %v476_v18 = vpop.f32.mrf.mxu0 }
 0x2ae   :  { %v481_v19 = vsel %vm479_vm3, %v474_v15, %v480_v17 }
 0x2af   :  { %v498_v20 = vpack.c.bf16 %v481_v19, %v481_v19  ;;  %v870_v21 = vpop.f32.mrf.mxu0 }
 0x2b1   :  { %888 = vmatmul.mubr.bf16.vlgmr.msra.gmra.mxu1 %v498_v20 }
 0x371   :  { %v585_v26 = vpop.f32.mrf.mxu1 }
 0x372   :  { %v586_v27 = vadd.f32 %v585_v26, %v502_v25 }
 0x373   :  { %v889_v28 = vpop.f32.mrf.mxu1 }
 0x374   :  { %vm591_vm4 = vcmp.gt.f32.partialorder %v586_v27, 0.0  ;;  %v592_v29 = vmul.f32 0.2, %v586_v27 }
 0x375   :  { %v588_v30 = vpop.f32.mrf.mxu1 }
 0x376   :  { %v593_v31 = vsel %vm591_vm4, %v586_v27, %v592_v29 }
 0x377   :  { %v594_v32 = vpack.c.bf16 %v593_v31, %v593_v31  ;;  %v890_v33 = vpop.f32.mrf.mxu1 }
 0x379   :  { %908 = vmatmul.mubr.bf16.vlgmr.msra.gmra.mxu0 %v594_v32 }
 0x439   :  { %v700_v34 = vpop.f32.mrf.mxu0 }
 0x43a   :  { %v701_v35 = vadd.f32 %v764_v0, %v700_v34 }
 0x43b   :  { %v909_v36 = vpop.f32.mrf.mxu0 }
 0x43c   :  { %706 = vst [vmem:[#allocation10] sm:$0xff] %v701_v35 }
 0x43d   :  { %v703_v37 = vpop.f32.mrf.mxu0 }
 0x43e   :  { %1061 = shalt.err (!%p1058_p10)
}
 0x43f   :  { %716 = dma.vmem_to_hbm [thread:$0]  %s714_s21, 128, %s1209_s6, [#allocation4]   ;;  %v910_v38 = vpop.f32.mrf.mxu0 }
 0x440   :  { %1076 = dma.done.wait [#allocation4], 128  }
 0x441   :  { %1077 = vsyncadd [#allocation4], 4294967168 }
 0x442   :  { %720 = vsyncpa [#allocation3], 1 }
 0x443   :  { %721 = vsyncpa [#allocation6], 1 }
 0x444   :  { %722 = vsyncpa [#allocation9], 1 }
 0x445   :  { %723 = vsyncpa [#allocation4], 1 }

</bundles_post_ra>
